<compile_context>
chip_gen: v5e
topology: v5e:2x2
jax: 0.10.0
libtpu: 0.0.40
codegen_flags: <defaults>
</compile_context>

<pallas_src>
import functools

import jax
import jax.numpy as jnp
from jax.experimental import pallas as pl
from jax.experimental.pallas import tpu as pltpu


def _round_up(v, m):
    return (v + m - 1) // m * m


def _output_kernel(x_ref, wmid_ref, bmid_ref, wout_ref, bout_ref,
                   gamma_ref, beta_ref, o_ref, *, h_real, h_pad, matmul_dtype):
    x = x_ref[...]                                           # (TM, Hp) f32

    # dense_mid: (TM, Hp) @ (Hp, Mp) on the MXU, f32 accumulation.
    mid = jnp.dot(x.astype(matmul_dtype), wmid_ref[...],
                  preferred_element_type=jnp.float32)
    mid = mid + bmid_ref[...]

    # dropout (eval mode) -> identity
    # TODO(synk): training-mode dropout RNG is not reproduced (inference only).

    # exact GELU: 0.5 * x * (1 + erf(x / sqrt(2)))  (F.gelu default)
    inv_sqrt2 = jnp.float32(0.7071067811865476)
    mid = 0.5 * mid * (1.0 + jax.lax.erf(mid * inv_sqrt2))

    # dense_out: (TM, Mp) @ (Mp, Hp) on the MXU, f32 accumulation.
    out = jnp.dot(mid.astype(matmul_dtype), wout_ref[...],
                  preferred_element_type=jnp.float32)

    # residual + folded output bias, fully in f32 with the original f32 x.
    # Padded lanes of x / out / b_out are exactly zero, so h stays zero there.
    h = x + out + bout_ref[...]

    # LayerNorm over the *real* hidden width (padded lanes excluded), eps=1e-12.
    inv_h = jnp.float32(1.0 / h_real)
    mean = jnp.sum(h, axis=-1, keepdims=True) * inv_h
    centered = h - mean
    if h_pad != h_real:
        lane = jax.lax.broadcasted_iota(jnp.int32, (1, h_pad), 1)
        centered_sq = jnp.where(lane < h_real, centered, 0.0)
    else:
        centered_sq = centered
    var = jnp.sum(centered_sq * centered_sq, axis=-1, keepdims=True) * inv_h
    normed = centered * jax.lax.rsqrt(var + jnp.float32(1e-12))
    o_ref[...] = normed * gamma_ref[...] + beta_ref[...]


def output_forward(x, w_mid, b_mid, w_out, b_out, gamma, beta, *,
                   row_tile=256, matmul_dtype=jnp.bfloat16):
    """x: (batch, seq, hidden). Weights stored PyTorch-style:
    w_mid: (middle, hidden), w_out: (hidden, middle)."""
    B, S, H = x.shape
    M = w_mid.shape[0]
    N = B * S

    # Lane-dense blocks: pad hidden/middle to multiples of 128 (zero padding is
    # exact: padded lanes contribute 0 to every dot product / sum).
    Hp = _round_up(H, 128)
    Mp = _round_up(M, 128)

    # Row tile: large enough to fill the MXU, multiple of 8 sublanes, clamped to
    # the (padded) row count; ragged last tile handled by zero-padding the rows.
    row_tile = _round_up(max(8, min(row_tile, _round_up(N, 8))), 8)
    Np = _round_up(N, row_tile)

    x2 = x.reshape(N, H).astype(jnp.float32)
    if (Np, Hp) != (N, H):
        x2 = jnp.pad(x2, ((0, Np - N), (0, Hp - H)))

    wmid_t = jnp.pad(w_mid.T.astype(jnp.float32),
                     ((0, Hp - H), (0, Mp - M))).astype(matmul_dtype)   # (Hp, Mp)
    wout_t = jnp.pad(w_out.T.astype(jnp.float32),
                     ((0, Mp - M), (0, Hp - H))).astype(matmul_dtype)   # (Mp, Hp)
    bmid2 = jnp.pad(b_mid.astype(jnp.float32), (0, Mp - M)).reshape(1, Mp)
    bout2 = jnp.pad(b_out.astype(jnp.float32), (0, Hp - H)).reshape(1, Hp)
    gamma2 = jnp.pad(gamma.astype(jnp.float32), (0, Hp - H)).reshape(1, Hp)
    beta2 = jnp.pad(beta.astype(jnp.float32), (0, Hp - H)).reshape(1, Hp)

    grid = (Np // row_tile,)

    w_bytes = jnp.dtype(matmul_dtype).itemsize
    cost = pl.CostEstimate(
        flops=2 * 2 * Np * Hp * Mp,                 # two dense layers
        transcendentals=Np * Mp,                    # erf in GELU
        bytes_accessed=(2 * Np * Hp * 4             # x in, y out (f32)
                        + 2 * Hp * Mp * w_bytes     # both weight matrices
                        + (3 * Hp + Mp) * 4),       # biases / gamma / beta
    )

    kernel = functools.partial(_output_kernel, h_real=H, h_pad=Hp,
                               matmul_dtype=matmul_dtype)

    out2 = pl.pallas_call(
        kernel,
        out_shape=jax.ShapeDtypeStruct((Np, Hp), jnp.float32),
        grid_spec=pl.GridSpec(
            grid=grid,
            in_specs=[
                pl.BlockSpec((row_tile, Hp), lambda i: (i, 0)),   # x rows
                pl.BlockSpec((Hp, Mp), lambda i: (0, 0)),         # W_mid^T (grid-invariant)
                pl.BlockSpec((1, Mp), lambda i: (0, 0)),          # b_mid
                pl.BlockSpec((Mp, Hp), lambda i: (0, 0)),         # W_out^T (grid-invariant)
                pl.BlockSpec((1, Hp), lambda i: (0, 0)),          # b_out
                pl.BlockSpec((1, Hp), lambda i: (0, 0)),          # gamma
                pl.BlockSpec((1, Hp), lambda i: (0, 0)),          # beta
            ],
            out_specs=pl.BlockSpec((row_tile, Hp), lambda i: (i, 0)),
        ),
        compiler_params=pltpu.CompilerParams(
            dimension_semantics=("parallel",),      # shards rows across TCs on v7x
            vmem_limit_bytes=64 * 1024 * 1024,
        ),
        cost_estimate=cost,
    )(x2, wmid_t, bmid2, wout_t, bout2, gamma2, beta2)

    if (Np, Hp) != (N, H):
        out2 = out2[:N, :H]
    return out2.reshape(B, S, H)


def _reference(x, w_mid, b_mid, w_out, b_out, gamma, beta):
    mid = x @ w_mid.T + b_mid
    mid = jax.nn.gelu(mid, approximate=False)
    out = mid @ w_out.T + b_out
    h = x + out
    mean = jnp.mean(h, axis=-1, keepdims=True)
    var = jnp.mean((h - mean) ** 2, axis=-1, keepdims=True)
    return (h - mean) / jnp.sqrt(var + 1e-12) * gamma + beta


if __name__ == "__main__":
    key = jax.random.PRNGKey(0)
    B, S, H, M = 2, 8, 32, 64      # batch, seq, hidden_size, middle_size

    k_x, k_wm, k_bm, k_wo, k_bo = jax.random.split(key, 5)
    x = jax.random.normal(k_x, (B, S, H), dtype=jnp.float32)

    # Deterministic parameter init (uniform, like nn.Linear's kaiming-uniform scale)
    lim_mid = 1.0 / jnp.sqrt(H)
    lim_out = 1.0 / jnp.sqrt(M)
    w_mid = jax.random.uniform(k_wm, (M, H), jnp.float32, -lim_mid, lim_mid)
    b_mid = jax.random.uniform(k_bm, (M,), jnp.float32, -lim_mid, lim_mid)
    w_out = jax.random.uniform(k_wo, (H, M), jnp.float32, -lim_out, lim_out)
    b_out = jax.random.uniform(k_bo, (H,), jnp.float32, -lim_out, lim_out)
    gamma = jnp.ones((H,), jnp.float32)
    beta = jnp.zeros((H,), jnp.float32)

    y_ref = _reference(x, w_mid, b_mid, w_out, b_out, gamma, beta)

    # 1) Exact-precision path (f32 matmuls): must match the f32 reference tightly.
    y_f32 = output_forward(x, w_mid, b_mid, w_out, b_out, gamma, beta,
                           matmul_dtype=jnp.float32)
    y_f32 = jax.block_until_ready(y_f32)
    assert y_f32.shape == (B, S, H)
    assert jnp.allclose(y_f32, y_ref, atol=1e-5, rtol=1e-5), \
        f"f32 path max err {jnp.max(jnp.abs(y_f32 - y_ref))}"

    # 2) Performance path (bf16 matmul inputs, f32 accumulation + f32 LayerNorm):
    #    tolerance reflects bf16 input rounding only.
    y_bf16 = output_forward(x, w_mid, b_mid, w_out, b_out, gamma, beta)
    y_bf16 = jax.block_until_ready(y_bf16)
    assert y_bf16.shape == (B, S, H)
    assert jnp.allclose(y_bf16, y_ref, atol=2e-2, rtol=2e-2), \
        f"bf16 path max err {jnp.max(jnp.abs(y_bf16 - y_ref))}"

    print("KERNEL_OK")
</pallas_src>

<mosaic_0001>
module attributes {stable_mosaic.version = 11 : i64} {
  func.func @_output_kernel(%arg0: i32, %arg1: memref<16x128xf32, #tpu.memory_space<vmem>>, %arg2: memref<128x128xf32, #tpu.memory_space<vmem>>, %arg3: memref<1x128xf32, #tpu.memory_space<vmem>>, %arg4: memref<128x128xf32, #tpu.memory_space<vmem>>, %arg5: memref<1x128xf32, #tpu.memory_space<vmem>>, %arg6: memref<1x128xf32, #tpu.memory_space<vmem>>, %arg7: memref<1x128xf32, #tpu.memory_space<vmem>>, %arg8: memref<16x128xf32, #tpu.memory_space<vmem>>) attributes {dimension_semantics = [#tpu.dimension_semantics<parallel>], iteration_bounds = array<i64: 1>, scalar_prefetch = 0 : i64, scratch_operands = 0 : i64, tpu.core_type = #tpu.core_type<tc>, window_params = [{transform_indices = @transform_0, window_bounds = array<i64: 16, 128>}, {pipeline_mode = #tpu.pipeline_mode<synchronous>, transform_indices = @transform_1, window_bounds = array<i64: 128, 128>}, {pipeline_mode = #tpu.pipeline_mode<synchronous>, transform_indices = @transform_2, window_bounds = array<i64: 1, 128>}, {pipeline_mode = #tpu.pipeline_mode<synchronous>, transform_indices = @transform_3, window_bounds = array<i64: 128, 128>}, {pipeline_mode = #tpu.pipeline_mode<synchronous>, transform_indices = @transform_4, window_bounds = array<i64: 1, 128>}, {pipeline_mode = #tpu.pipeline_mode<synchronous>, transform_indices = @transform_5, window_bounds = array<i64: 1, 128>}, {pipeline_mode = #tpu.pipeline_mode<synchronous>, transform_indices = @transform_6, window_bounds = array<i64: 1, 128>}, {transform_indices = @transform_7, window_bounds = array<i64: 16, 128>}]} {
    %c0 = arith.constant 0 : index
    %c0_0 = arith.constant 0 : index
    %0 = vector.load %arg1[%c0, %c0_0] : memref<16x128xf32, #tpu.memory_space<vmem>>, vector<16x128xf32>
    %c0_1 = arith.constant 0 : index
    %c0_2 = arith.constant 0 : index
    %1 = vector.load %arg2[%c0_1, %c0_2] : memref<128x128xf32, #tpu.memory_space<vmem>>, vector<128x128xf32>
    %cst = arith.constant dense<0.000000e+00> : vector<16x128xf32>
    %2 = tpu.matmul %0, %1, %cst {dimension_numbers = #tpu.dot_dimension_numbers<[1], [0], [0], [1], [0, 0, 1, 1], [], []>} : vector<16x128xf32>, vector<128x128xf32>, vector<16x128xf32> -> vector<16x128xf32>
    %c0_3 = arith.constant 0 : index
    %c0_4 = arith.constant 0 : index
    %3 = vector.load %arg3[%c0_3, %c0_4] : memref<1x128xf32, #tpu.memory_space<vmem>>, vector<1x128xf32>
    %4 = vector.broadcast %3 : vector<1x128xf32> to vector<16x128xf32>
    %5 = arith.addf %2, %4 : vector<16x128xf32>
    %cst_5 = arith.constant 5.000000e-01 : f32
    %6 = vector.broadcast %cst_5 : f32 to vector<16x128xf32>
    %7 = arith.mulf %6, %5 : vector<16x128xf32>
    %cst_6 = arith.constant 0.707106769 : f32
    %8 = vector.broadcast %cst_6 : f32 to vector<16x128xf32>
    %9 = arith.mulf %5, %8 : vector<16x128xf32>
    %10 = math.erf %9 : vector<16x128xf32>
    %cst_7 = arith.constant 1.000000e+00 : f32
    %11 = vector.broadcast %cst_7 : f32 to vector<16x128xf32>
    %12 = arith.addf %11, %10 : vector<16x128xf32>
    %13 = arith.mulf %7, %12 : vector<16x128xf32>
    %c0_8 = arith.constant 0 : index
    %c0_9 = arith.constant 0 : index
    %14 = vector.load %arg4[%c0_8, %c0_9] : memref<128x128xf32, #tpu.memory_space<vmem>>, vector<128x128xf32>
    %cst_10 = arith.constant dense<0.000000e+00> : vector<16x128xf32>
    %15 = tpu.matmul %13, %14, %cst_10 {dimension_numbers = #tpu.dot_dimension_numbers<[1], [0], [0], [1], [0, 0, 1, 1], [], []>} : vector<16x128xf32>, vector<128x128xf32>, vector<16x128xf32> -> vector<16x128xf32>
    %16 = arith.addf %0, %15 : vector<16x128xf32>
    %c0_11 = arith.constant 0 : index
    %c0_12 = arith.constant 0 : index
    %17 = vector.load %arg5[%c0_11, %c0_12] : memref<1x128xf32, #tpu.memory_space<vmem>>, vector<1x128xf32>
    %18 = vector.broadcast %17 : vector<1x128xf32> to vector<16x128xf32>
    %19 = arith.addf %16, %18 : vector<16x128xf32>
    %cst_13 = arith.constant dense<0.000000e+00> : vector<16xf32>
    %20 = vector.multi_reduction <add>, %19, %cst_13 [1] : vector<16x128xf32> to vector<16xf32>
    %21 = vector.shape_cast %20 : vector<16xf32> to vector<16x1xf32>
    %cst_14 = arith.constant 3.125000e-02 : f32
    %22 = vector.broadcast %cst_14 : f32 to vector<16x1xf32>
    %23 = arith.mulf %21, %22 : vector<16x1xf32>
    %24 = vector.broadcast %23 : vector<16x1xf32> to vector<16x128xf32>
    %25 = arith.subf %19, %24 : vector<16x128xf32>
    %26 = tpu.iota {dimensions = array<i32: 1>} : vector<1x128xi32>
    %c32_i32 = arith.constant 32 : i32
    %27 = vector.broadcast %c32_i32 : i32 to vector<1x128xi32>
    %28 = arith.cmpi slt, %26, %27 : vector<1x128xi32>
    %cst_15 = arith.constant 0.000000e+00 : f32
    %29 = vector.shape_cast %28 : vector<1x128xi1> to vector<1x128xi1>
    %30 = vector.broadcast %29 : vector<1x128xi1> to vector<16x128xi1>
    %31 = vector.broadcast %cst_15 : f32 to vector<16x128xf32>
    %32 = arith.select %30, %25, %31 : vector<16x128xi1>, vector<16x128xf32>
    %33 = arith.mulf %32, %32 : vector<16x128xf32>
    %cst_16 = arith.constant dense<0.000000e+00> : vector<16xf32>
    %34 = vector.multi_reduction <add>, %33, %cst_16 [1] : vector<16x128xf32> to vector<16xf32>
    %35 = vector.shape_cast %34 : vector<16xf32> to vector<16x1xf32>
    %cst_17 = arith.constant 3.125000e-02 : f32
    %36 = vector.broadcast %cst_17 : f32 to vector<16x1xf32>
    %37 = arith.mulf %35, %36 : vector<16x1xf32>
    %cst_18 = arith.constant 9.99999996E-13 : f32
    %38 = vector.broadcast %cst_18 : f32 to vector<16x1xf32>
    %39 = arith.addf %37, %38 : vector<16x1xf32>
    %40 = math.rsqrt %39 : vector<16x1xf32>
    %41 = vector.broadcast %40 : vector<16x1xf32> to vector<16x128xf32>
    %42 = arith.mulf %25, %41 : vector<16x128xf32>
    %c0_19 = arith.constant 0 : index
    %c0_20 = arith.constant 0 : index
    %43 = vector.load %arg6[%c0_19, %c0_20] : memref<1x128xf32, #tpu.memory_space<vmem>>, vector<1x128xf32>
    %44 = vector.broadcast %43 : vector<1x128xf32> to vector<16x128xf32>
    %45 = arith.mulf %42, %44 : vector<16x128xf32>
    %c0_21 = arith.constant 0 : index
    %c0_22 = arith.constant 0 : index
    %46 = vector.load %arg7[%c0_21, %c0_22] : memref<1x128xf32, #tpu.memory_space<vmem>>, vector<1x128xf32>
    %47 = vector.broadcast %46 : vector<1x128xf32> to vector<16x128xf32>
    %48 = arith.addf %45, %47 : vector<16x128xf32>
    %c0_23 = arith.constant 0 : index
    %c0_24 = arith.constant 0 : index
    %49 = vector.load %arg8[%c0_23, %c0_24] : memref<16x128xf32, #tpu.memory_space<vmem>>, vector<16x128xf32>
    tpu.vector_store %arg8[%c0_23, %c0_24], %48 {strides = array<i32>} : memref<16x128xf32, #tpu.memory_space<vmem>>, vector<16x128xf32>,
    return
  }
  func.func @transform_0(%arg0: i32) -> (i32, i32) {
    %c0_i32 = arith.constant 0 : i32
    %c0_i32_0 = arith.constant 0 : i32
    return %arg0, %c0_i32 : i32, i32
  }
  func.func @transform_1(%arg0: i32) -> (i32, i32) {
    %c0_i32 = arith.constant 0 : i32
    %c0_i32_0 = arith.constant 0 : i32
    %c0_i32_1 = arith.constant 0 : i32
    return %c0_i32, %c0_i32_0 : i32, i32
  }
  func.func @transform_2(%arg0: i32) -> (i32, i32) {
    %c0_i32 = arith.constant 0 : i32
    %c0_i32_0 = arith.constant 0 : i32
    %c0_i32_1 = arith.constant 0 : i32
    return %c0_i32, %c0_i32_0 : i32, i32
  }
  func.func @transform_3(%arg0: i32) -> (i32, i32) {
    %c0_i32 = arith.constant 0 : i32
    %c0_i32_0 = arith.constant 0 : i32
    %c0_i32_1 = arith.constant 0 : i32
    return %c0_i32, %c0_i32_0 : i32, i32
  }
  func.func @transform_4(%arg0: i32) -> (i32, i32) {
    %c0_i32 = arith.constant 0 : i32
    %c0_i32_0 = arith.constant 0 : i32
    %c0_i32_1 = arith.constant 0 : i32
    return %c0_i32, %c0_i32_0 : i32, i32
  }
  func.func @transform_5(%arg0: i32) -> (i32, i32) {
    %c0_i32 = arith.constant 0 : i32
    %c0_i32_0 = arith.constant 0 : i32
    %c0_i32_1 = arith.constant 0 : i32
    return %c0_i32, %c0_i32_0 : i32, i32
  }
  func.func @transform_6(%arg0: i32) -> (i32, i32) {
    %c0_i32 = arith.constant 0 : i32
    %c0_i32_0 = arith.constant 0 : i32
    %c0_i32_1 = arith.constant 0 : i32
    return %c0_i32, %c0_i32_0 : i32, i32
  }
  func.func @transform_7(%arg0: i32) -> (i32, i32) {
    %c0_i32 = arith.constant 0 : i32
    %c0_i32_0 = arith.constant 0 : i32
    return %arg0, %c0_i32 : i32, i32
  }
}

</mosaic_0001>

<bundles_post_ra>
// kernel: tpu_custom_call.1
= control target key start
LH: loop header
LB: loop body
LE: loop exit
PB: predicated region body
PF: predicated region fallthrough
CT: control target
= control target key end

     0   :  { %12 = vsyncpa [#allocation3], 0  ;;  %s609_s0 = inlined_call_operand.hbm [shape: f32[16,128], index: 0, kind: input, shape index: {}]   ;;  %s610_s1 = inlined_call_operand.hbm [shape: f32[128,128], index: 1, kind: input, shape index: {}]   ;;  %s611_s2 = inlined_call_operand.vmem [shape: f32[1,128], index: 2, kind: input, shape index: {}]   ;;  %s612_s3 = inlined_call_operand.hbm [shape: f32[128,128], index: 3, kind: input, shape index: {}]   ;;  %s613_s4 = inlined_call_operand.vmem [shape: f32[1,128], index: 4, kind: input, shape index: {}]   ;;  %s614_s5 = inlined_call_operand.vmem [shape: f32[1,128], index: 5, kind: input, shape index: {}]   ;;  %s615_s6 = inlined_call_operand.vmem [shape: f32[1,128], index: 6, kind: input, shape index: {}]   ;;  %s616_s7 = inlined_call_operand.hbm [shape: f32[16,128], index: 7, kind: output, shape index: {}]  }
   0x1   :  { %13 = vsyncpa [#allocation6], 0 }
   0x2   :  { %14 = vsyncpa [#allocation4], 0  ;;  %s32_s26 = sshll.u32 %s610_s1, 4  ;;  %s489_s27 = smov [#allocation5]   ;;  %s33_s26 = int_to_ptr.hbm [resolvable:$true] %s32_s26 }
   0x3   :  { %s34_s28 = sshll.u32 %s489_s27, 4  ;;  %s19_s8 = sshll.u32 %s609_s0, 4  ;;  %s35_s28 = int_to_ptr.vmem [resolvable:$true] %s34_s28  ;;  %s20_s8 = int_to_ptr.hbm [resolvable:$true] %s19_s8 }
   0x4   :  { %s490_s9 = smov 128   ;;  %s491_s10 = smov 8  }
   0x5   :  { %40 = dma.hbm_to_vmem [thread:$0]  %s33_s26, 2048, %s35_s28, [#allocation6], %s490_s9, %s490_s9, %s491_s10  }
   0x6   :  { %s492_s11 = smov [#allocation2]   ;;  %s47_s1 = sshll.u32 %s612_s3, 4  ;;  %s48_s1 = int_to_ptr.hbm [resolvable:$true] %s47_s1 }
   0x7   :  { %s21_s12 = sshll.u32 %s492_s11, 4  ;;  %s493_s0 = smov [#allocation7]   ;;  %s22_s12 = int_to_ptr.vmem [resolvable:$true] %s21_s12 }
   0x8   :  { %27 = dma.hbm_to_vmem [thread:$0]  %s20_s8, 256, %s22_s12, [#allocation3], %s490_s9, %s490_s9, %s491_s10  }
   0x9   :  { %s49_s15 = sshll.u32 %s493_s0, 4  ;;  %s50_s15 = int_to_ptr.vmem [resolvable:$true] %s49_s15 }
   0xa   :  { %55 = dma.hbm_to_vmem [thread:$0]  %s48_s1, 2048, %s50_s15, [#allocation6], %s490_s9, %s490_s9, %s491_s10  }
   0xb   :  { %483 = dma.done.wait [#allocation3], 256  }
   0xc   :  { %484 = vsyncadd [#allocation3], 4294967040 }
   0xd   :  { %485 = dma.done.wait [#allocation6], 4096  }
   0xe   :  { %486 = vsyncadd [#allocation6], 4294963200  ;;  %v91_v0 = vld [vmem:[#allocation5 + $0x78] sm:$0xff]  ;;  %v90_v1 = vld [vmem:[#allocation5 + $0x70] sm:$0xff]  ;;  %s321_s24 = sshll.u32 %s616_s7, 4  ;;  %s322_s24 = int_to_ptr.hbm [resolvable:$true] %s321_s24 }
   0xf   :  { %96 = vmatpush.msra.mxu0 %v91_v0  ;;  %337 = vmatpush.msra.mxu2 %v91_v0  ;;  %v89_v2 = vld [vmem:[#allocation5 + $0x68] sm:$0xff]  ;;  %v88_v3 = vld [vmem:[#allocation5 + $0x60] sm:$0xff]  ;;  %v87_v4 = vld [vmem:[#allocation5 + $0x58] sm:$0xff] }
  0x10   :  { %v86_v5 = vld [vmem:[#allocation5 + $0x50] sm:$0xff]  ;;  %v85_v6 = vld [vmem:[#allocation5 + $0x48] sm:$0xff]  ;;  %v84_v7 = vld [vmem:[#allocation5 + $0x40] sm:$0xff] }
  0x11   :  { %97 = vmatpush.msra.mxu0 %v90_v1  ;;  %338 = vmatpush.msra.mxu2 %v90_v1  ;;  %v83_v8 = vld [vmem:[#allocation5 + $0x38] sm:$0xff]  ;;  %v82_v9 = vld [vmem:[#allocation5 + $0x30] sm:$0xff]  ;;  %v81_v10 = vld [vmem:[#allocation5 + $0x28] sm:$0xff] }
  0x12   :  { %v80_v11 = vld [vmem:[#allocation5 + $0x20] sm:$0xff]  ;;  %v79_v12 = vld [vmem:[#allocation5 + $0x18] sm:$0xff]  ;;  %v78_v13 = vld [vmem:[#allocation5 + $0x10] sm:$0xff] }
  0x13   :  { %98 = vmatpush.msra.mxu0 %v89_v2  ;;  %339 = vmatpush.msra.mxu2 %v89_v2  ;;  %v77_v14 = vld [vmem:[#allocation5 + $0x8] sm:$0xff]  ;;  %v76_v15 = vld [vmem:[#allocation5] sm:$0xff]  ;;  %v553_v16 = vld [vmem:[#allocation2] sm:$0xff] }
  0x14   :  { %v555_v17 = vld [vmem:[#allocation2 + $0x8] sm:$0xff]  ;;  %v221_v19 = vld [vmem:[#allocation7 + $0x70] sm:$0xff]  ;;  %v220_v20 = vld [vmem:[#allocation7 + $0x68] sm:$0xff] }
  0x15   :  { %99 = vmatpush.msra.mxu0 %v88_v3  ;;  %340 = vmatpush.msra.mxu2 %v88_v3  ;;  %v222_v18 = vld [vmem:[#allocation7 + $0x78] sm:$0xff]  ;;  %v219_v21 = vld [vmem:[#allocation7 + $0x60] sm:$0xff]  ;;  %v375_v22 = vld [vmem:[%s611_s2] ss:$0 sm:$0xff] }
  0x16   :  { %223 = vmatpush.msra.mxu1 %v222_v18  ;;  %353 = vmatpush.msra.mxu3 %v222_v18  ;;  %v218_v23 = vld [vmem:[#allocation7 + $0x58] sm:$0xff]  ;;  %v217_v25 = vld [vmem:[#allocation7 + $0x50] sm:$0xff]  ;;  %v216_v27 = vld [vmem:[#allocation7 + $0x48] sm:$0xff] }
  0x17   :  { %100 = vmatpush.msra.mxu0 %v87_v4  ;;  %341 = vmatpush.msra.mxu2 %v87_v4  ;;  %v215_v29 = vld [vmem:[#allocation7 + $0x40] sm:$0xff]  ;;  %v214_v30 = vld [vmem:[#allocation7 + $0x38] sm:$0xff]  ;;  %v213_v33 = vld [vmem:[#allocation7 + $0x30] sm:$0xff] }
  0x18   :  { %224 = vmatpush.msra.mxu1 %v221_v19  ;;  %354 = vmatpush.msra.mxu3 %v221_v19  ;;  %v212_v36 = vld [vmem:[#allocation7 + $0x28] sm:$0xff]  ;;  %v211_v39 = vld [vmem:[#allocation7 + $0x20] sm:$0xff]  ;;  %v210_v43 = vld [vmem:[#allocation7 + $0x18] sm:$0xff] }
  0x19   :  { %101 = vmatpush.msra.mxu0 %v86_v5  ;;  %342 = vmatpush.msra.mxu2 %v86_v5  ;;  %v209_v47 = vld [vmem:[#allocation7 + $0x10] sm:$0xff]  ;;  %v208_v52 = vld [vmem:[#allocation7 + $0x8] sm:$0xff]  ;;  %v207_v56 = vld [vmem:[#allocation7] sm:$0xff] }
  0x1a   :  { %225 = vmatpush.msra.mxu1 %v220_v20  ;;  %355 = vmatpush.msra.mxu3 %v220_v20 }
  0x1b   :  { %102 = vmatpush.msra.mxu0 %v85_v6  ;;  %343 = vmatpush.msra.mxu2 %v85_v6 }
  0x1c   :  { %226 = vmatpush.msra.mxu1 %v219_v21  ;;  %356 = vmatpush.msra.mxu3 %v219_v21 }
  0x1d   :  { %103 = vmatpush.msra.mxu0 %v84_v7  ;;  %344 = vmatpush.msra.mxu2 %v84_v7 }
  0x1e   :  { %227 = vmatpush.msra.mxu1 %v218_v23  ;;  %357 = vmatpush.msra.mxu3 %v218_v23 }
  0x1f   :  { %104 = vmatpush.msra.mxu0 %v83_v8  ;;  %345 = vmatpush.msra.mxu2 %v83_v8 }
  0x20   :  { %228 = vmatpush.msra.mxu1 %v217_v25  ;;  %358 = vmatpush.msra.mxu3 %v217_v25 }
  0x21   :  { %105 = vmatpush.msra.mxu0 %v82_v9  ;;  %346 = vmatpush.msra.mxu2 %v82_v9 }
  0x22   :  { %229 = vmatpush.msra.mxu1 %v216_v27  ;;  %359 = vmatpush.msra.mxu3 %v216_v27 }
  0x23   :  { %106 = vmatpush.msra.mxu0 %v81_v10  ;;  %347 = vmatpush.msra.mxu2 %v81_v10 }
  0x24   :  { %230 = vmatpush.msra.mxu1 %v215_v29  ;;  %360 = vmatpush.msra.mxu3 %v215_v29 }
  0x25   :  { %107 = vmatpush.msra.mxu0 %v80_v11  ;;  %348 = vmatpush.msra.mxu2 %v80_v11 }
  0x26   :  { %231 = vmatpush.msra.mxu1 %v214_v30  ;;  %361 = vmatpush.msra.mxu3 %v214_v30 }
  0x27   :  { %108 = vmatpush.msra.mxu0 %v79_v12  ;;  %349 = vmatpush.msra.mxu2 %v79_v12 }
  0x28   :  { %232 = vmatpush.msra.mxu1 %v213_v33  ;;  %362 = vmatpush.msra.mxu3 %v213_v33 }
  0x29   :  { %109 = vmatpush.msra.mxu0 %v78_v13  ;;  %350 = vmatpush.msra.mxu2 %v78_v13 }
  0x2a   :  { %233 = vmatpush.msra.mxu1 %v212_v36  ;;  %363 = vmatpush.msra.mxu3 %v212_v36 }
  0x2b   :  { %110 = vmatpush.msra.mxu0 %v77_v14  ;;  %351 = vmatpush.msra.mxu2 %v77_v14 }
  0x2c   :  { %234 = vmatpush.msra.mxu1 %v211_v39  ;;  %364 = vmatpush.msra.mxu3 %v211_v39 }
  0x2d   :  { %111 = vmatpush.msra.mxu0 %v76_v15  ;;  %352 = vmatpush.msra.mxu2 %v76_v15 }
  0x2e   :  { %112 = vmatmul.f32.vlgmr.msra.gmra.mxu0 %v553_v16  ;;  %115 = vmatmul.f32.vlgmr.msra.gmra.mxu2 %v555_v17 }
  0x2f   :  { %235 = vmatpush.msra.mxu1 %v210_v43  ;;  %365 = vmatpush.msra.mxu3 %v210_v43 }
  0x31   :  { %236 = vmatpush.msra.mxu1 %v209_v47  ;;  %366 = vmatpush.msra.mxu3 %v209_v47 }
  0x33   :  { %237 = vmatpush.msra.mxu1 %v208_v52  ;;  %367 = vmatpush.msra.mxu3 %v208_v52 }
  0x35   :  { %238 = vmatpush.msra.mxu1 %v207_v56  ;;  %368 = vmatpush.msra.mxu3 %v207_v56 }
  0xab   :  { %v113_v24 = vpop.f32.mrf.mxu0 }
  0xac   :  { %v562_v26 = vadd.f32 %v375_v22, %v113_v24 }
  0xae   :  { %v565_v28 = vmul.f32 0.70710677, %v562_v26 }
  0xb0   :  { %v123_v31 = vmul.f32 %v565_v28, %v565_v28 }
  0xb1   :  { %v116_v32 = vpop.f32.mrf.mxu2 }
  0xb2   :  { %v569_v34 = vmin.f32 %v123_v31, 16.0  ;;  %v571_v35 = vadd.f32 %v375_v22, %v116_v32 }
  0xb4   :  { %v125_v37 = vmul.f32 2.1237322e-06, %v569_v34  ;;  %v575_v38 = vmul.f32 0.70710677, %v571_v35  ;;  %v136_v40 = vmul.f32 3.8918573e-05, %v569_v34 }
  0xb6   :  { %v126_v41 = vadd.f32 0.00028619796, %v125_v37  ;;  %v163_v42 = vmul.f32 %v575_v38, %v575_v38  ;;  %v137_v44 = vadd.f32 0.001143296, %v136_v40 }
  0xb8   :  { %v127_v45 = vmul.f32 %v126_v41, %v569_v34  ;;  %v164_v46 = vmin.f32 %v163_v42, 16.0  ;;  %v138_v48 = vmul.f32 %v137_v44, %v569_v34 }
  0xba   :  { %v165_v49 = vmul.f32 2.1237322e-06, %v164_v46  ;;  %v176_v50 = vmul.f32 3.8918573e-05, %v164_v46  ;;  %v128_v51 = vadd.f32 0.0036580483, %v127_v45 }
  0xbb   :  { %v139_v53 = vadd.f32 0.014752088, %v138_v48 }
  0xbc   :  { %v166_v54 = vadd.f32 0.00028619796, %v165_v49  ;;  %v177_v55 = vadd.f32 0.001143296, %v176_v50  ;;  %v129_v60 = vmul.f32 %v128_v51, %v569_v34  ;;  %v119_v49 = vmul.f32 0.5, %v562_v26 }
  0xbd   :  { %v140_v57 = vmul.f32 %v139_v53, %v569_v34 }
  0xbe   :  { %v167_v58 = vmul.f32 %v166_v54, %v164_v46  ;;  %v178_v59 = vmul.f32 %v177_v55, %v164_v46  ;;  %v130_v2 = vadd.f32 0.05243302, %v129_v60  ;;  %v120_v55 = vmul.f32 0.5, %v571_v35 }
  0xbf   :  { %v141_v61 = vadd.f32 0.112945676, %v140_v57 }
  0xc0   :  { %v168_v62 = vadd.f32 0.0036580483, %v167_v58  ;;  %v179_v63 = vadd.f32 0.014752088, %v178_v59  ;;  %v131_v8 = vmul.f32 %v130_v2, %v569_v34  ;;  %v376_v58 = vld [vmem:[%s613_s4] ss:$0 sm:$0xff] }
  0xc1   :  { %v142_v0 = vmul.f32 %v141_v61, %v569_v34 }
  0xc2   :  { %v180_v1 = vmul.f32 %v179_v63, %v164_v46  ;;  %v169_v4 = vmul.f32 %v168_v62, %v164_v46  ;;  %v132_v13 = vadd.f32 0.18741608, %v131_v8  ;;  %v262_v63 = vlaneseq }
  0xc3   :  { %v143_v3 = vadd.f32 0.4994258, %v142_v0 }
  0xc4   :  { %v181_v5 = vadd.f32 0.112945676, %v180_v1  ;;  %v170_v10 = vadd.f32 0.05243302, %v169_v4  ;;  %v133_v19 = vmul.f32 %v132_v13, %v569_v34  ;;  %v263_v0 = vand.u32 127, %v262_v63 }
  0xc5   :  { %v144_v6 = vmul.f32 %v143_v3, %v569_v34 }
  0xc6   :  { %v182_v7 = vmul.f32 %v181_v5, %v164_v46  ;;  %v171_v14 = vmul.f32 %v170_v10, %v164_v46  ;;  %v134_v23 = vadd.f32 1.1283791, %v133_v19  ;;  %vm264_vm8 = vcmp.lt.s32.totalorder %v263_v0, 32 }
  0xc7   :  { %v145_v9 = vadd.f32 1.0, %v144_v6 }
  0xc8   :  { %v183_v11 = vadd.f32 0.4994258, %v182_v7  ;;  %v172_v20 = vadd.f32 0.18741608, %v171_v14  ;;  %v135_v33 = vmul.f32 %v134_v23, %v565_v28 }
  0xc9   :  { %379 = vrcp.f32 %v145_v9  ;;  %v157_v24 = vand.u32 2147483648, %v145_v9  ;;  %v155_v30 = vand.u32 2147483647, %v145_v9  ;;  %vm151_vm1 = vweird.f32 %v145_v9 }
  0xca   :  { %v184_v12 = vmul.f32 %v183_v11, %v164_v46  ;;  %v173_v27 = vmul.f32 %v172_v20, %v164_v46 }
  0xcb   :  { %v158_v36 = vor.u32 1.1754944e-38, %v157_v24  ;;  %vm156_vm3 = vcmp.eq.f32.partialorder %v155_v30, 8.507059e+37 }
  0xcc   :  { %v185_v15 = vadd.f32 1.0, %v184_v12  ;;  %v174_v39 = vadd.f32 1.1283791, %v173_v27 }
  0xce   :  { %381 = vrcp.f32 %v185_v15  ;;  %v197_v40 = vand.u32 2147483648, %v185_v15  ;;  %v195_v43 = vand.u32 2147483647, %v185_v15  ;;  %vm191_vm5 = vweird.f32 %v185_v15 }
  0xcf   :  { %v380_v18 = vpop.eup %379  ;;  %v175_v48 = vmul.f32 %v174_v39, %v575_v38 }
  0xd0   :  { %v147_v21 = vmul.f32 %v380_v18, %v145_v9  ;;  %vm152_vm0 = vweird.f32 %v380_v18  ;;  %v198_v47 = vor.u32 1.1754944e-38, %v197_v40  ;;  %vm196_vm7 = vcmp.eq.f32.partialorder %v195_v43, 8.507059e+37 }
  0xd1   :  { %vm153_vm2 = vmor %vm151_vm1, %vm152_vm0 }
  0xd2   :  { %v148_v22 = vsub.f32 1.0, %v147_v21 }
  0xd4   :  { %v382_v25 = vpop.eup %381  ;;  %v149_v29 = vmul.f32 %v380_v18, %v148_v22  ;;  %v377_v22 = vld [vmem:[%s614_s5] ss:$0 sm:$0xff]  ;;  %s494_s5 = smov [#allocation8]  }
  0xd5   :  { %v187_v31 = vmul.f32 %v382_v25, %v185_v15  ;;  %vm192_vm4 = vweird.f32 %v382_v25  ;;  %s319_s21 = sshll.u32 %s494_s5, 4  ;;  %s320_s21 = int_to_ptr.vmem [resolvable:$true] %s319_s21 }
  0xd6   :  { %v150_v32 = vadd.f32 %v380_v18, %v149_v29  ;;  %vm193_vm6 = vmor %vm191_vm5, %vm192_vm4  ;;  %v378_v29 = vld [vmem:[%s615_s6] ss:$0 sm:$0xff] }
  0xd7   :  { %v188_v37 = vsub.f32 1.0, %v187_v31 }
  0xd8   :  { %v154_v34 = vsel %vm153_vm2, %v380_v18, %v150_v32 }
  0xd9   :  { %v159_v41 = vsel %vm156_vm3, %v158_v36, %v154_v34  ;;  %v189_v42 = vmul.f32 %v382_v25, %v188_v37 }
  0xda   :  { %v160_v44 = vmul.f32 %v159_v41, %v135_v33 }
  0xdb   :  { %v190_v45 = vadd.f32 %v382_v25, %v189_v42 }
  0xdc   :  { %v335_v46 = vclamps-f32 %v160_v44, 1.0 }
  0xdd   :  { %v194_v28 = vsel %vm193_vm6, %v382_v25, %v190_v45 }
  0xde   :  { %v203_v50 = vadd.f32 1.0, %v335_v46  ;;  %v199_v51 = vsel %vm196_vm7, %v198_v47, %v194_v28 }
  0xdf   :  { %v200_v52 = vmul.f32 %v199_v51, %v175_v48 }
  0xe0   :  { %v205_v53 = vmul.f32 %v203_v50, %v119_v49 }
  0xe1   :  { %v336_v54 = vclamps-f32 %v200_v52, 1.0 }
  0xe2   :  { %239 = vmatmul.f32.vlgmr.msra.gmra.mxu1 %v205_v53 }
  0xe3   :  { %v204_v56 = vadd.f32 1.0, %v336_v54 }
  0xe5   :  { %v206_v57 = vmul.f32 %v204_v56, %v120_v55 }
  0xe7   :  { %242 = vmatmul.f32.vlgmr.msra.gmra.mxu3 %v206_v57 }
 0x15f   :  { %v240_v38 = vpop.f32.mrf.mxu1 }
 0x160   :  { %v246_v59 = vadd.f32 %v240_v38, %v553_v16 }
 0x162   :  { %v252_v60 = vadd.f32 %v376_v58, %v246_v59 }
 0x164   :  { %254 = vadd.xlane.f32.xlu0 %v252_v60 }
 0x16a   :  { %v243_v26 = vpop.f32.mrf.mxu3 }
 0x16b   :  { %v247_v61 = vadd.f32 %v243_v26, %v555_v17 }
 0x16d   :  { %v253_v62 = vadd.f32 %v376_v58, %v247_v61 }
 0x16f   :  { %256 = vadd.xlane.f32.xlu0 %v253_v62 }
 0x1d7   :  { %v255_v35 = vpop.xlane.xlu0 %254 }
 0x1d8   :  { %v258_v1 = vmul.f32 0.03125, %v255_v35 }
 0x1da   :  { %v260_v2 = vsub.f32 %v252_v60, %v258_v1 }
 0x1dc   :  { %v267_v3 = vsel %vm264_vm8, %v260_v2, 0.0 }
 0x1dd   :  { %v269_v4 = vmul.f32 %v267_v3, %v267_v3 }
 0x1df   :  { %271 = vadd.xlane.f32.xlu1 %v269_v4 }
 0x1e2   :  { %v257_v5 = vpop.xlane.xlu0 %256 }
 0x1e3   :  { %v259_v6 = vmul.f32 0.03125, %v257_v5 }
 0x1e5   :  { %v261_v7 = vsub.f32 %v253_v62, %v259_v6 }
 0x1e7   :  { %v268_v16 = vsel %vm264_vm8, %v261_v7, 0.0 }
 0x1e8   :  { %v270_v8 = vmul.f32 %v268_v16, %v268_v16 }
 0x1ea   :  { %273 = vadd.xlane.f32.xlu1 %v270_v8 }
 0x252   :  { %v272_v9 = vpop.xlane.xlu1 %271 }
 0x253   :  { %v275_v10 = vmul.f32 0.03125, %v272_v9 }
 0x255   :  { %v277_v17 = vadd.f32 1e-12, %v275_v10 }
 0x257   :  { %383 = vrsqrt.f32 %v277_v17  ;;  %vm285_vm10 = vweird.f32 %v277_v17 }
 0x25d   :  { %v384_v11 = vpop.eup %383  ;;  %v274_v12 = vpop.xlane.xlu1 %273 }
 0x25e   :  { %v280_v13 = vmul.f32 %v384_v11, %v277_v17  ;;  %v276_v14 = vmul.f32 0.03125, %v274_v12  ;;  %vm286_vm9 = vweird.f32 %v384_v11 }
 0x25f   :  { %vm287_vm11 = vmor %vm285_vm10, %vm286_vm9 }
 0x260   :  { %v281_v15 = vmul.f32 %v384_v11, %v280_v13  ;;  %v278_v18 = vadd.f32 1e-12, %v276_v14 }
 0x262   :  { %v282_v19 = vmul.f32 0.5, %v281_v15  ;;  %385 = vrsqrt.f32 %v278_v18  ;;  %vm295_vm13 = vweird.f32 %v278_v18 }
 0x264   :  { %v283_v20 = vsub.f32 1.5, %v282_v19 }
 0x266   :  { %v284_v21 = vmul.f32 %v384_v11, %v283_v20 }
 0x268   :  { %v386_v23 = vpop.eup %385  ;;  %v288_v24 = vsel %vm287_vm11, %v384_v11, %v284_v21 }
 0x269   :  { %v299_v25 = vmul.f32 %v288_v24, %v260_v2  ;;  %v290_v27 = vmul.f32 %v386_v23, %v278_v18  ;;  %vm296_vm12 = vweird.f32 %v386_v23 }
 0x26a   :  { %vm297_vm14 = vmor %vm295_vm13, %vm296_vm12 }
 0x26b   :  { %v291_v30 = vmul.f32 %v386_v23, %v290_v27  ;;  %v305_v31 = vmul.f32 %v377_v22, %v299_v25 }
 0x26d   :  { %v292_v32 = vmul.f32 0.5, %v291_v30  ;;  %v311_v33 = vadd.f32 %v378_v29, %v305_v31 }
 0x26f   :  { %v293_v36 = vsub.f32 1.5, %v292_v32  ;;  %313 = vst [vmem:[#allocation8] sm:$0xff] %v311_v33 }
 0x271   :  { %v294_v37 = vmul.f32 %v386_v23, %v293_v36 }
 0x273   :  { %v298_v39 = vsel %vm297_vm14, %v386_v23, %v294_v37 }
 0x274   :  { %v300_v34 = vmul.f32 %v298_v39, %v261_v7 }
 0x276   :  { %v306_v40 = vmul.f32 %v377_v22, %v300_v34 }
 0x278   :  { %v312_v41 = vadd.f32 %v378_v29, %v306_v40 }
 0x27a   :  { %314 = vst [vmem:[#allocation8 + $0x8] sm:$0xff] %v312_v41 }
 0x27b   :  { %327 = dma.vmem_to_hbm [thread:$0]  %s320_s21, 256, %s322_s24, [#allocation4], %s490_s9, %s490_s9, %s491_s10  }
 0x27c   :  { %487 = dma.done.wait [#allocation4], 256  }
 0x27d   :  { %488 = vsyncadd [#allocation4], 4294967040 }
 0x27e   :  { %332 = vsyncpa [#allocation3], 1 }
 0x27f   :  { %333 = vsyncpa [#allocation6], 1 }
 0x280   :  { %334 = vsyncpa [#allocation4], 1 }

</bundles_post_ra>
